<compile_context>
chip_gen: v5e
topology: v5e:2x2
jax: 0.10.0
libtpu: 0.0.40
codegen_flags: <defaults>
</compile_context>

<pallas_src>
import numpy as np
import jax
import jax.numpy as jnp
from jax.experimental import pallas as pl
from jax.experimental.pallas import tpu as pltpu

C_IN, C_OUT, K, PAD = 6, 12, 50, 25
CP = 8                     # C_IN padded up to one full sublane group
HALO = 128                 # right halo width (>= K - 1, multiple of 128)
NEG_SLOPE = 0.01           # nn.LeakyReLU default
BN_EPS = 1e-5              # nn.BatchNorm1d default


def _round_up(x, m):
    return ((x + m - 1) // m) * m


def _make_kernel(tile_l):
    def kernel(xm_ref, xh_ref, w_ref, cst_ref, o_ref, patch_ref):
        # slab[c, j] = x_pad[n, c, lt*tile_l + j],  j in [0, tile_l + HALO)
        slab = jnp.concatenate([xm_ref[...], xh_ref[...]], axis=-1)
        # In-kernel im2col: K shifted (CP, tile_l) slices -> (K*CP, tile_l).
        for k in range(K):
            patch_ref[pl.ds(k * CP, CP), :] = slab[:, k:k + tile_l]
        # (C_OUT, K*CP) @ (K*CP, tile_l) on the MXU, f32 accumulation.
        acc = jnp.dot(w_ref[...], patch_ref[...],
                      preferred_element_type=jnp.float32)
        acc = acc + cst_ref[:, 0:1]                          # conv bias
        acc = jnp.where(acc > 0, acc, NEG_SLOPE * acc)       # LeakyReLU
        # Dropout1d(p=0.1): identity in inference mode.
        # BatchNorm1d (eval): folded per-channel scale/shift.
        o_ref[...] = (acc * cst_ref[:, 1:2] + cst_ref[:, 2:3]).astype(o_ref.dtype)
    return kernel


def upscaling_cnn_forward(x, params, *, tile_l=1024):
    """x: (N, 6, L) float32  ->  (N, 12, L+1) float32."""
    w = params["w"]                      # (C_out, C_in, K)
    b = params["b"]                      # (C_out,)
    gamma, beta = params["gamma"], params["beta"]
    r_mean, r_var = params["running_mean"], params["running_var"]

    N, Cin, L = x.shape
    assert Cin == C_IN
    L_out = L + 2 * PAD - K + 1          # = L + 1

    # Tile size: multiple of 128, no larger than needed for small inputs.
    tile_l = max(128, min(_round_up(tile_l, 128), _round_up(L_out, 128)))
    num_lt = pl.cdiv(L_out, tile_l)
    L_out_pad = num_lt * tile_l
    L_padded = L_out_pad + HALO          # every main tile + its halo in range

    # Pad channels 6 -> 8 (aligned sublanes); pad spatial dim with the conv's
    # PAD zeros on the left and zeros on the right out to L_padded.
    x_pad = jnp.pad(x.astype(jnp.float32),
                    ((0, 0), (0, CP - C_IN), (PAD, L_padded - PAD - L)))

    # Weight in (C_OUT, K*CP) layout matching the in-kernel patch ordering
    # (k-major, channel-minor; dummy channels zero-padded).
    w_mat = jnp.pad(jnp.transpose(w, (0, 2, 1)),
                    ((0, 0), (0, 0), (0, CP - C_IN)))
    w_mat = w_mat.reshape(C_OUT, K * CP).astype(jnp.float32)

    # Fold eval-mode BatchNorm into per-channel affine and merge with the conv
    # bias into one constant block: [:,0]=bias, [:,1]=scale, [:,2]=shift.
    scale = gamma / jnp.sqrt(r_var + BN_EPS)
    shift = beta - r_mean * scale
    consts = jnp.stack([b, scale, shift], axis=1).astype(jnp.float32)  # (12, 3)

    out = pl.pallas_call(
        _make_kernel(tile_l),
        out_shape=jax.ShapeDtypeStruct((N, C_OUT, L_out_pad), jnp.float32),
        grid_spec=pltpu.PrefetchScalarGridSpec(
            num_scalar_prefetch=0,
            grid=(N, num_lt),
            in_specs=[
                # main slab: x_pad[n, :, lt*tile_l : (lt+1)*tile_l]
                pl.BlockSpec((None, CP, tile_l), lambda n, lt: (n, 0, lt)),
                # halo slab: x_pad[n, :, (lt+1)*tile_l : (lt+1)*tile_l + HALO]
                pl.BlockSpec((None, CP, HALO),
                             lambda n, lt: (n, 0, (lt + 1) * (tile_l // HALO))),
                pl.BlockSpec((C_OUT, K * CP), lambda n, lt: (0, 0)),  # weights
                pl.BlockSpec((C_OUT, 3), lambda n, lt: (0, 0)),       # bias/scale/shift
            ],
            out_specs=pl.BlockSpec((None, C_OUT, tile_l),
                                   lambda n, lt: (n, 0, lt)),
            scratch_shapes=[pltpu.VMEM((K * CP, tile_l), jnp.float32)],
        ),
        compiler_params=pltpu.CompilerParams(
            dimension_semantics=("parallel", "parallel"),
            vmem_limit_bytes=32 * 1024 * 1024),
    )(x_pad, x_pad, w_mat, consts)

    # TODO(synk): self.specializationModel = FinetunedCNN(CNN()) is not defined
    # in the provided source; treated as identity here.
    return out[:, :, :L_out]


def _reference_forward(x, params):
    """Pure-JAX reference (XLA conv) for a correctness check."""
    w, b = params["w"], params["b"]
    y = jax.lax.conv_general_dilated(
        x, w, window_strides=(1,), padding=[(PAD, PAD)],
        dimension_numbers=("NCH", "OIH", "NCH"))
    y = y + b[None, :, None]
    y = jnp.where(y > 0, y, NEG_SLOPE * y)
    scale = params["gamma"] / jnp.sqrt(params["running_var"] + BN_EPS)
    shift = params["beta"] - params["running_mean"] * scale
    return y * scale[None, :, None] + shift[None, :, None]


def _init_params(key):
    k1, k2, k3, k4, k5, k6 = jax.random.split(key, 6)
    bound = 1.0 / np.sqrt(C_IN * K)
    return {
        "w": jax.random.uniform(k1, (C_OUT, C_IN, K), jnp.float32, -bound, bound),
        "b": jax.random.uniform(k2, (C_OUT,), jnp.float32, -bound, bound),
        "gamma": jax.random.uniform(k3, (C_OUT,), jnp.float32, 0.5, 1.5),
        "beta": jax.random.uniform(k4, (C_OUT,), jnp.float32, -0.5, 0.5),
        "running_mean": 0.1 * jax.random.normal(k5, (C_OUT,), jnp.float32),
        "running_var": jax.random.uniform(k6, (C_OUT,), jnp.float32, 0.5, 1.5),
    }


if __name__ == "__main__":
    key = jax.random.PRNGKey(0)
    k_params, k_x = jax.random.split(key)

    params = _init_params(k_params)
    # N=2 batches, 6 input channels, L=127 samples  ->  output (2, 12, 128)
    x = jax.random.normal(k_x, (2, C_IN, 127), dtype=jnp.float32)

    y = upscaling_cnn_forward(x, params)
    y = jax.block_until_ready(y)

    y_ref = jax.block_until_ready(_reference_forward(x, params))
    np.testing.assert_allclose(np.asarray(y), np.asarray(y_ref),
                               rtol=1e-3, atol=1e-3)

    assert y.shape == (2, C_OUT, 128)
    print("KERNEL_OK")
</pallas_src>

<mosaic_0001>
module attributes {stable_mosaic.version = 11 : i64} {
  func.func @kernel(%arg0: i32, %arg1: i32, %arg2: memref<1x8x128xf32, #tpu.memory_space<vmem>>, %arg3: memref<1x8x128xf32, #tpu.memory_space<vmem>>, %arg4: memref<12x400xf32, #tpu.memory_space<vmem>>, %arg5: memref<12x3xf32, #tpu.memory_space<vmem>>, %arg6: memref<1x12x128xf32, #tpu.memory_space<vmem>>, %arg7: memref<400x128xf32, #tpu.memory_space<vmem>>) attributes {dimension_semantics = [#tpu.dimension_semantics<parallel>, #tpu.dimension_semantics<parallel>], iteration_bounds = array<i64: 2, 1>, scalar_prefetch = 0 : i64, scratch_operands = 1 : i64, tpu.core_type = #tpu.core_type<tc>, window_params = [{transform_indices = @transform_0, window_bounds = array<i64: 1, 8, 128>}, {transform_indices = @transform_1, window_bounds = array<i64: 1, 8, 128>}, {pipeline_mode = #tpu.pipeline_mode<synchronous>, transform_indices = @transform_2, window_bounds = array<i64: 12, 400>}, {pipeline_mode = #tpu.pipeline_mode<synchronous>, transform_indices = @transform_3, window_bounds = array<i64: 12, 3>}, {transform_indices = @transform_4, window_bounds = array<i64: 1, 12, 128>}]} {
    %c0 = arith.constant 0 : index
    %c0_0 = arith.constant 0 : index
    %c0_1 = arith.constant 0 : index
    %0 = vector.load %arg2[%c0, %c0_0, %c0_1] : memref<1x8x128xf32, #tpu.memory_space<vmem>>, vector<1x8x128xf32>
    %1 = vector.shape_cast %0 : vector<1x8x128xf32> to vector<8x128xf32>
    %c0_2 = arith.constant 0 : index
    %c0_3 = arith.constant 0 : index
    %c0_4 = arith.constant 0 : index
    %2 = vector.load %arg3[%c0_2, %c0_3, %c0_4] : memref<1x8x128xf32, #tpu.memory_space<vmem>>, vector<1x8x128xf32>
    %3 = vector.shape_cast %2 : vector<1x8x128xf32> to vector<8x128xf32>
    %4 = tpu.concatenate %1, %3 in 1 : vector<8x128xf32>, vector<8x128xf32> -> vector<8x256xf32>
    %5 = vector.extract_strided_slice %4 {offsets = [0, 0], sizes = [8, 128], strides = [1, 1]} : vector<8x256xf32> to vector<8x128xf32>
    %c0_5 = arith.constant 0 : index
    %c0_6 = arith.constant 0 : index
    %6 = vector.load %arg7[%c0_5, %c0_6] : memref<400x128xf32, #tpu.memory_space<vmem>>, vector<8x128xf32>
    tpu.vector_store %arg7[%c0_5, %c0_6], %5 {strides = array<i32>} : memref<400x128xf32, #tpu.memory_space<vmem>>, vector<8x128xf32>,
    %7 = vector.extract_strided_slice %4 {offsets = [0, 1], sizes = [8, 128], strides = [1, 1]} : vector<8x256xf32> to vector<8x128xf32>
    %c8 = arith.constant 8 : index
    %c0_7 = arith.constant 0 : index
    %8 = vector.load %arg7[%c8, %c0_7] : memref<400x128xf32, #tpu.memory_space<vmem>>, vector<8x128xf32>
    tpu.vector_store %arg7[%c8, %c0_7], %7 {strides = array<i32>} : memref<400x128xf32, #tpu.memory_space<vmem>>, vector<8x128xf32>,
    %9 = vector.extract_strided_slice %4 {offsets = [0, 2], sizes = [8, 128], strides = [1, 1]} : vector<8x256xf32> to vector<8x128xf32>
    %c16 = arith.constant 16 : index
    %c0_8 = arith.constant 0 : index
    %10 = vector.load %arg7[%c16, %c0_8] : memref<400x128xf32, #tpu.memory_space<vmem>>, vector<8x128xf32>
    tpu.vector_store %arg7[%c16, %c0_8], %9 {strides = array<i32>} : memref<400x128xf32, #tpu.memory_space<vmem>>, vector<8x128xf32>,
    %11 = vector.extract_strided_slice %4 {offsets = [0, 3], sizes = [8, 128], strides = [1, 1]} : vector<8x256xf32> to vector<8x128xf32>
    %c24 = arith.constant 24 : index
    %c0_9 = arith.constant 0 : index
    %12 = vector.load %arg7[%c24, %c0_9] : memref<400x128xf32, #tpu.memory_space<vmem>>, vector<8x128xf32>
    tpu.vector_store %arg7[%c24, %c0_9], %11 {strides = array<i32>} : memref<400x128xf32, #tpu.memory_space<vmem>>, vector<8x128xf32>,
    %13 = vector.extract_strided_slice %4 {offsets = [0, 4], sizes = [8, 128], strides = [1, 1]} : vector<8x256xf32> to vector<8x128xf32>
    %c32 = arith.constant 32 : index
    %c0_10 = arith.constant 0 : index
    %14 = vector.load %arg7[%c32, %c0_10] : memref<400x128xf32, #tpu.memory_space<vmem>>, vector<8x128xf32>
    tpu.vector_store %arg7[%c32, %c0_10], %13 {strides = array<i32>} : memref<400x128xf32, #tpu.memory_space<vmem>>, vector<8x128xf32>,
    %15 = vector.extract_strided_slice %4 {offsets = [0, 5], sizes = [8, 128], strides = [1, 1]} : vector<8x256xf32> to vector<8x128xf32>
    %c40 = arith.constant 40 : index
    %c0_11 = arith.constant 0 : index
    %16 = vector.load %arg7[%c40, %c0_11] : memref<400x128xf32, #tpu.memory_space<vmem>>, vector<8x128xf32>
    tpu.vector_store %arg7[%c40, %c0_11], %15 {strides = array<i32>} : memref<400x128xf32, #tpu.memory_space<vmem>>, vector<8x128xf32>,
    %17 = vector.extract_strided_slice %4 {offsets = [0, 6], sizes = [8, 128], strides = [1, 1]} : vector<8x256xf32> to vector<8x128xf32>
    %c48 = arith.constant 48 : index
    %c0_12 = arith.constant 0 : index
    %18 = vector.load %arg7[%c48, %c0_12] : memref<400x128xf32, #tpu.memory_space<vmem>>, vector<8x128xf32>
    tpu.vector_store %arg7[%c48, %c0_12], %17 {strides = array<i32>} : memref<400x128xf32, #tpu.memory_space<vmem>>, vector<8x128xf32>,
    %19 = vector.extract_strided_slice %4 {offsets = [0, 7], sizes = [8, 128], strides = [1, 1]} : vector<8x256xf32> to vector<8x128xf32>
    %c56 = arith.constant 56 : index
    %c0_13 = arith.constant 0 : index
    %20 = vector.load %arg7[%c56, %c0_13] : memref<400x128xf32, #tpu.memory_space<vmem>>, vector<8x128xf32>
    tpu.vector_store %arg7[%c56, %c0_13], %19 {strides = array<i32>} : memref<400x128xf32, #tpu.memory_space<vmem>>, vector<8x128xf32>,
    %21 = vector.extract_strided_slice %4 {offsets = [0, 8], sizes = [8, 128], strides = [1, 1]} : vector<8x256xf32> to vector<8x128xf32>
    %c64 = arith.constant 64 : index
    %c0_14 = arith.constant 0 : index
    %22 = vector.load %arg7[%c64, %c0_14] : memref<400x128xf32, #tpu.memory_space<vmem>>, vector<8x128xf32>
    tpu.vector_store %arg7[%c64, %c0_14], %21 {strides = array<i32>} : memref<400x128xf32, #tpu.memory_space<vmem>>, vector<8x128xf32>,
    %23 = vector.extract_strided_slice %4 {offsets = [0, 9], sizes = [8, 128], strides = [1, 1]} : vector<8x256xf32> to vector<8x128xf32>
    %c72 = arith.constant 72 : index
    %c0_15 = arith.constant 0 : index
    %24 = vector.load %arg7[%c72, %c0_15] : memref<400x128xf32, #tpu.memory_space<vmem>>, vector<8x128xf32>
    tpu.vector_store %arg7[%c72, %c0_15], %23 {strides = array<i32>} : memref<400x128xf32, #tpu.memory_space<vmem>>, vector<8x128xf32>,
    %25 = vector.extract_strided_slice %4 {offsets = [0, 10], sizes = [8, 128], strides = [1, 1]} : vector<8x256xf32> to vector<8x128xf32>
    %c80 = arith.constant 80 : index
    %c0_16 = arith.constant 0 : index
    %26 = vector.load %arg7[%c80, %c0_16] : memref<400x128xf32, #tpu.memory_space<vmem>>, vector<8x128xf32>
    tpu.vector_store %arg7[%c80, %c0_16], %25 {strides = array<i32>} : memref<400x128xf32, #tpu.memory_space<vmem>>, vector<8x128xf32>,
    %27 = vector.extract_strided_slice %4 {offsets = [0, 11], sizes = [8, 128], strides = [1, 1]} : vector<8x256xf32> to vector<8x128xf32>
    %c88 = arith.constant 88 : index
    %c0_17 = arith.constant 0 : index
    %28 = vector.load %arg7[%c88, %c0_17] : memref<400x128xf32, #tpu.memory_space<vmem>>, vector<8x128xf32>
    tpu.vector_store %arg7[%c88, %c0_17], %27 {strides = array<i32>} : memref<400x128xf32, #tpu.memory_space<vmem>>, vector<8x128xf32>,
    %29 = vector.extract_strided_slice %4 {offsets = [0, 12], sizes = [8, 128], strides = [1, 1]} : vector<8x256xf32> to vector<8x128xf32>
    %c96 = arith.constant 96 : index
    %c0_18 = arith.constant 0 : index
    %30 = vector.load %arg7[%c96, %c0_18] : memref<400x128xf32, #tpu.memory_space<vmem>>, vector<8x128xf32>
    tpu.vector_store %arg7[%c96, %c0_18], %29 {strides = array<i32>} : memref<400x128xf32, #tpu.memory_space<vmem>>, vector<8x128xf32>,
    %31 = vector.extract_strided_slice %4 {offsets = [0, 13], sizes = [8, 128], strides = [1, 1]} : vector<8x256xf32> to vector<8x128xf32>
    %c104 = arith.constant 104 : index
    %c0_19 = arith.constant 0 : index
    %32 = vector.load %arg7[%c104, %c0_19] : memref<400x128xf32, #tpu.memory_space<vmem>>, vector<8x128xf32>
    tpu.vector_store %arg7[%c104, %c0_19], %31 {strides = array<i32>} : memref<400x128xf32, #tpu.memory_space<vmem>>, vector<8x128xf32>,
    %33 = vector.extract_strided_slice %4 {offsets = [0, 14], sizes = [8, 128], strides = [1, 1]} : vector<8x256xf32> to vector<8x128xf32>
    %c112 = arith.constant 112 : index
    %c0_20 = arith.constant 0 : index
    %34 = vector.load %arg7[%c112, %c0_20] : memref<400x128xf32, #tpu.memory_space<vmem>>, vector<8x128xf32>
    tpu.vector_store %arg7[%c112, %c0_20], %33 {strides = array<i32>} : memref<400x128xf32, #tpu.memory_space<vmem>>, vector<8x128xf32>,
    %35 = vector.extract_strided_slice %4 {offsets = [0, 15], sizes = [8, 128], strides = [1, 1]} : vector<8x256xf32> to vector<8x128xf32>
    %c120 = arith.constant 120 : index
    %c0_21 = arith.constant 0 : index
    %36 = vector.load %arg7[%c120, %c0_21] : memref<400x128xf32, #tpu.memory_space<vmem>>, vector<8x128xf32>
    tpu.vector_store %arg7[%c120, %c0_21], %35 {strides = array<i32>} : memref<400x128xf32, #tpu.memory_space<vmem>>, vector<8x128xf32>,
    %37 = vector.extract_strided_slice %4 {offsets = [0, 16], sizes = [8, 128], strides = [1, 1]} : vector<8x256xf32> to vector<8x128xf32>
    %c128 = arith.constant 128 : index
    %c0_22 = arith.constant 0 : index
    %38 = vector.load %arg7[%c128, %c0_22] : memref<400x128xf32, #tpu.memory_space<vmem>>, vector<8x128xf32>
    tpu.vector_store %arg7[%c128, %c0_22], %37 {strides = array<i32>} : memref<400x128xf32, #tpu.memory_space<vmem>>, vector<8x128xf32>,
    %39 = vector.extract_strided_slice %4 {offsets = [0, 17], sizes = [8, 128], strides = [1, 1]} : vector<8x256xf32> to vector<8x128xf32>
    %c136 = arith.constant 136 : index
    %c0_23 = arith.constant 0 : index
    %40 = vector.load %arg7[%c136, %c0_23] : memref<400x128xf32, #tpu.memory_space<vmem>>, vector<8x128xf32>
    tpu.vector_store %arg7[%c136, %c0_23], %39 {strides = array<i32>} : memref<400x128xf32, #tpu.memory_space<vmem>>, vector<8x128xf32>,
    %41 = vector.extract_strided_slice %4 {offsets = [0, 18], sizes = [8, 128], strides = [1, 1]} : vector<8x256xf32> to vector<8x128xf32>
    %c144 = arith.constant 144 : index
    %c0_24 = arith.constant 0 : index
    %42 = vector.load %arg7[%c144, %c0_24] : memref<400x128xf32, #tpu.memory_space<vmem>>, vector<8x128xf32>
    tpu.vector_store %arg7[%c144, %c0_24], %41 {strides = array<i32>} : memref<400x128xf32, #tpu.memory_space<vmem>>, vector<8x128xf32>,
    %43 = vector.extract_strided_slice %4 {offsets = [0, 19], sizes = [8, 128], strides = [1, 1]} : vector<8x256xf32> to vector<8x128xf32>
    %c152 = arith.constant 152 : index
    %c0_25 = arith.constant 0 : index
    %44 = vector.load %arg7[%c152, %c0_25] : memref<400x128xf32, #tpu.memory_space<vmem>>, vector<8x128xf32>
    tpu.vector_store %arg7[%c152, %c0_25], %43 {strides = array<i32>} : memref<400x128xf32, #tpu.memory_space<vmem>>, vector<8x128xf32>,
    %45 = vector.extract_strided_slice %4 {offsets = [0, 20], sizes = [8, 128], strides = [1, 1]} : vector<8x256xf32> to vector<8x128xf32>
    %c160 = arith.constant 160 : index
    %c0_26 = arith.constant 0 : index
    %46 = vector.load %arg7[%c160, %c0_26] : memref<400x128xf32, #tpu.memory_space<vmem>>, vector<8x128xf32>
    tpu.vector_store %arg7[%c160, %c0_26], %45 {strides = array<i32>} : memref<400x128xf32, #tpu.memory_space<vmem>>, vector<8x128xf32>,
    %47 = vector.extract_strided_slice %4 {offsets = [0, 21], sizes = [8, 128], strides = [1, 1]} : vector<8x256xf32> to vector<8x128xf32>
    %c168 = arith.constant 168 : index
    %c0_27 = arith.constant 0 : index
    %48 = vector.load %arg7[%c168, %c0_27] : memref<400x128xf32, #tpu.memory_space<vmem>>, vector<8x128xf32>
    tpu.vector_store %arg7[%c168, %c0_27], %47 {strides = array<i32>} : memref<400x128xf32, #tpu.memory_space<vmem>>, vector<8x128xf32>,
    %49 = vector.extract_strided_slice %4 {offsets = [0, 22], sizes = [8, 128], strides = [1, 1]} : vector<8x256xf32> to vector<8x128xf32>
    %c176 = arith.constant 176 : index
    %c0_28 = arith.constant 0 : index
    %50 = vector.load %arg7[%c176, %c0_28] : memref<400x128xf32, #tpu.memory_space<vmem>>, vector<8x128xf32>
    tpu.vector_store %arg7[%c176, %c0_28], %49 {strides = array<i32>} : memref<400x128xf32, #tpu.memory_space<vmem>>, vector<8x128xf32>,
    %51 = vector.extract_strided_slice %4 {offsets = [0, 23], sizes = [8, 128], strides = [1, 1]} : vector<8x256xf32> to vector<8x128xf32>
    %c184 = arith.constant 184 : index
    %c0_29 = arith.constant 0 : index
    %52 = vector.load %arg7[%c184, %c0_29] : memref<400x128xf32, #tpu.memory_space<vmem>>, vector<8x128xf32>
    tpu.vector_store %arg7[%c184, %c0_29], %51 {strides = array<i32>} : memref<400x128xf32, #tpu.memory_space<vmem>>, vector<8x128xf32>,
    %53 = vector.extract_strided_slice %4 {offsets = [0, 24], sizes = [8, 128], strides = [1, 1]} : vector<8x256xf32> to vector<8x128xf32>
    %c192 = arith.constant 192 : index
    %c0_30 = arith.constant 0 : index
    %54 = vector.load %arg7[%c192, %c0_30] : memref<400x128xf32, #tpu.memory_space<vmem>>, vector<8x128xf32>
    tpu.vector_store %arg7[%c192, %c0_30], %53 {strides = array<i32>} : memref<400x128xf32, #tpu.memory_space<vmem>>, vector<8x128xf32>,
    %55 = vector.extract_strided_slice %4 {offsets = [0, 25], sizes = [8, 128], strides = [1, 1]} : vector<8x256xf32> to vector<8x128xf32>
    %c200 = arith.constant 200 : index
    %c0_31 = arith.constant 0 : index
    %56 = vector.load %arg7[%c200, %c0_31] : memref<400x128xf32, #tpu.memory_space<vmem>>, vector<8x128xf32>
    tpu.vector_store %arg7[%c200, %c0_31], %55 {strides = array<i32>} : memref<400x128xf32, #tpu.memory_space<vmem>>, vector<8x128xf32>,
    %57 = vector.extract_strided_slice %4 {offsets = [0, 26], sizes = [8, 128], strides = [1, 1]} : vector<8x256xf32> to vector<8x128xf32>
    %c208 = arith.constant 208 : index
    %c0_32 = arith.constant 0 : index
    %58 = vector.load %arg7[%c208, %c0_32] : memref<400x128xf32, #tpu.memory_space<vmem>>, vector<8x128xf32>
    tpu.vector_store %arg7[%c208, %c0_32], %57 {strides = array<i32>} : memref<400x128xf32, #tpu.memory_space<vmem>>, vector<8x128xf32>,
    %59 = vector.extract_strided_slice %4 {offsets = [0, 27], sizes = [8, 128], strides = [1, 1]} : vector<8x256xf32> to vector<8x128xf32>
    %c216 = arith.constant 216 : index
    %c0_33 = arith.constant 0 : index
    %60 = vector.load %arg7[%c216, %c0_33] : memref<400x128xf32, #tpu.memory_space<vmem>>, vector<8x128xf32>
    tpu.vector_store %arg7[%c216, %c0_33], %59 {strides = array<i32>} : memref<400x128xf32, #tpu.memory_space<vmem>>, vector<8x128xf32>,
    %61 = vector.extract_strided_slice %4 {offsets = [0, 28], sizes = [8, 128], strides = [1, 1]} : vector<8x256xf32> to vector<8x128xf32>
    %c224 = arith.constant 224 : index
    %c0_34 = arith.constant 0 : index
    %62 = vector.load %arg7[%c224, %c0_34] : memref<400x128xf32, #tpu.memory_space<vmem>>, vector<8x128xf32>
    tpu.vector_store %arg7[%c224, %c0_34], %61 {strides = array<i32>} : memref<400x128xf32, #tpu.memory_space<vmem>>, vector<8x128xf32>,
    %63 = vector.extract_strided_slice %4 {offsets = [0, 29], sizes = [8, 128], strides = [1, 1]} : vector<8x256xf32> to vector<8x128xf32>
    %c232 = arith.constant 232 : index
    %c0_35 = arith.constant 0 : index
    %64 = vector.load %arg7[%c232, %c0_35] : memref<400x128xf32, #tpu.memory_space<vmem>>, vector<8x128xf32>
    tpu.vector_store %arg7[%c232, %c0_35], %63 {strides = array<i32>} : memref<400x128xf32, #tpu.memory_space<vmem>>, vector<8x128xf32>,
    %65 = vector.extract_strided_slice %4 {offsets = [0, 30], sizes = [8, 128], strides = [1, 1]} : vector<8x256xf32> to vector<8x128xf32>
    %c240 = arith.constant 240 : index
    %c0_36 = arith.constant 0 : index
    %66 = vector.load %arg7[%c240, %c0_36] : memref<400x128xf32, #tpu.memory_space<vmem>>, vector<8x128xf32>
    tpu.vector_store %arg7[%c240, %c0_36], %65 {strides = array<i32>} : memref<400x128xf32, #tpu.memory_space<vmem>>, vector<8x128xf32>,
    %67 = vector.extract_strided_slice %4 {offsets = [0, 31], sizes = [8, 128], strides = [1, 1]} : vector<8x256xf32> to vector<8x128xf32>
    %c248 = arith.constant 248 : index
    %c0_37 = arith.constant 0 : index
    %68 = vector.load %arg7[%c248, %c0_37] : memref<400x128xf32, #tpu.memory_space<vmem>>, vector<8x128xf32>
    tpu.vector_store %arg7[%c248, %c0_37], %67 {strides = array<i32>} : memref<400x128xf32, #tpu.memory_space<vmem>>, vector<8x128xf32>,
    %69 = vector.extract_strided_slice %4 {offsets = [0, 32], sizes = [8, 128], strides = [1, 1]} : vector<8x256xf32> to vector<8x128xf32>
    %c256 = arith.constant 256 : index
    %c0_38 = arith.constant 0 : index
    %70 = vector.load %arg7[%c256, %c0_38] : memref<400x128xf32, #tpu.memory_space<vmem>>, vector<8x128xf32>
    tpu.vector_store %arg7[%c256, %c0_38], %69 {strides = array<i32>} : memref<400x128xf32, #tpu.memory_space<vmem>>, vector<8x128xf32>,
    %71 = vector.extract_strided_slice %4 {offsets = [0, 33], sizes = [8, 128], strides = [1, 1]} : vector<8x256xf32> to vector<8x128xf32>
    %c264 = arith.constant 264 : index
    %c0_39 = arith.constant 0 : index
    %72 = vector.load %arg7[%c264, %c0_39] : memref<400x128xf32, #tpu.memory_space<vmem>>, vector<8x128xf32>
    tpu.vector_store %arg7[%c264, %c0_39], %71 {strides = array<i32>} : memref<400x128xf32, #tpu.memory_space<vmem>>, vector<8x128xf32>,
    %73 = vector.extract_strided_slice %4 {offsets = [0, 34], sizes = [8, 128], strides = [1, 1]} : vector<8x256xf32> to vector<8x128xf32>
    %c272 = arith.constant 272 : index
    %c0_40 = arith.constant 0 : index
    %74 = vector.load %arg7[%c272, %c0_40] : memref<400x128xf32, #tpu.memory_space<vmem>>, vector<8x128xf32>
    tpu.vector_store %arg7[%c272, %c0_40], %73 {strides = array<i32>} : memref<400x128xf32, #tpu.memory_space<vmem>>, vector<8x128xf32>,
    %75 = vector.extract_strided_slice %4 {offsets = [0, 35], sizes = [8, 128], strides = [1, 1]} : vector<8x256xf32> to vector<8x128xf32>
    %c280 = arith.constant 280 : index
    %c0_41 = arith.constant 0 : index
    %76 = vector.load %arg7[%c280, %c0_41] : memref<400x128xf32, #tpu.memory_space<vmem>>, vector<8x128xf32>
    tpu.vector_store %arg7[%c280, %c0_41], %75 {strides = array<i32>} : memref<400x128xf32, #tpu.memory_space<vmem>>, vector<8x128xf32>,
    %77 = vector.extract_strided_slice %4 {offsets = [0, 36], sizes = [8, 128], strides = [1, 1]} : vector<8x256xf32> to vector<8x128xf32>
    %c288 = arith.constant 288 : index
    %c0_42 = arith.constant 0 : index
    %78 = vector.load %arg7[%c288, %c0_42] : memref<400x128xf32, #tpu.memory_space<vmem>>, vector<8x128xf32>
    tpu.vector_store %arg7[%c288, %c0_42], %77 {strides = array<i32>} : memref<400x128xf32, #tpu.memory_space<vmem>>, vector<8x128xf32>,
    %79 = vector.extract_strided_slice %4 {offsets = [0, 37], sizes = [8, 128], strides = [1, 1]} : vector<8x256xf32> to vector<8x128xf32>
    %c296 = arith.constant 296 : index
    %c0_43 = arith.constant 0 : index
    %80 = vector.load %arg7[%c296, %c0_43] : memref<400x128xf32, #tpu.memory_space<vmem>>, vector<8x128xf32>
    tpu.vector_store %arg7[%c296, %c0_43], %79 {strides = array<i32>} : memref<400x128xf32, #tpu.memory_space<vmem>>, vector<8x128xf32>,
    %81 = vector.extract_strided_slice %4 {offsets = [0, 38], sizes = [8, 128], strides = [1, 1]} : vector<8x256xf32> to vector<8x128xf32>
    %c304 = arith.constant 304 : index
    %c0_44 = arith.constant 0 : index
    %82 = vector.load %arg7[%c304, %c0_44] : memref<400x128xf32, #tpu.memory_space<vmem>>, vector<8x128xf32>
    tpu.vector_store %arg7[%c304, %c0_44], %81 {strides = array<i32>} : memref<400x128xf32, #tpu.memory_space<vmem>>, vector<8x128xf32>,
    %83 = vector.extract_strided_slice %4 {offsets = [0, 39], sizes = [8, 128], strides = [1, 1]} : vector<8x256xf32> to vector<8x128xf32>
    %c312 = arith.constant 312 : index
    %c0_45 = arith.constant 0 : index
    %84 = vector.load %arg7[%c312, %c0_45] : memref<400x128xf32, #tpu.memory_space<vmem>>, vector<8x128xf32>
    tpu.vector_store %arg7[%c312, %c0_45], %83 {strides = array<i32>} : memref<400x128xf32, #tpu.memory_space<vmem>>, vector<8x128xf32>,
    %85 = vector.extract_strided_slice %4 {offsets = [0, 40], sizes = [8, 128], strides = [1, 1]} : vector<8x256xf32> to vector<8x128xf32>
    %c320 = arith.constant 320 : index
    %c0_46 = arith.constant 0 : index
    %86 = vector.load %arg7[%c320, %c0_46] : memref<400x128xf32, #tpu.memory_space<vmem>>, vector<8x128xf32>
    tpu.vector_store %arg7[%c320, %c0_46], %85 {strides = array<i32>} : memref<400x128xf32, #tpu.memory_space<vmem>>, vector<8x128xf32>,
    %87 = vector.extract_strided_slice %4 {offsets = [0, 41], sizes = [8, 128], strides = [1, 1]} : vector<8x256xf32> to vector<8x128xf32>
    %c328 = arith.constant 328 : index
    %c0_47 = arith.constant 0 : index
    %88 = vector.load %arg7[%c328, %c0_47] : memref<400x128xf32, #tpu.memory_space<vmem>>, vector<8x128xf32>
    tpu.vector_store %arg7[%c328, %c0_47], %87 {strides = array<i32>} : memref<400x128xf32, #tpu.memory_space<vmem>>, vector<8x128xf32>,
    %89 = vector.extract_strided_slice %4 {offsets = [0, 42], sizes = [8, 128], strides = [1, 1]} : vector<8x256xf32> to vector<8x128xf32>
    %c336 = arith.constant 336 : index
    %c0_48 = arith.constant 0 : index
    %90 = vector.load %arg7[%c336, %c0_48] : memref<400x128xf32, #tpu.memory_space<vmem>>, vector<8x128xf32>
    tpu.vector_store %arg7[%c336, %c0_48], %89 {strides = array<i32>} : memref<400x128xf32, #tpu.memory_space<vmem>>, vector<8x128xf32>,
    %91 = vector.extract_strided_slice %4 {offsets = [0, 43], sizes = [8, 128], strides = [1, 1]} : vector<8x256xf32> to vector<8x128xf32>
    %c344 = arith.constant 344 : index
    %c0_49 = arith.constant 0 : index
    %92 = vector.load %arg7[%c344, %c0_49] : memref<400x128xf32, #tpu.memory_space<vmem>>, vector<8x128xf32>
    tpu.vector_store %arg7[%c344, %c0_49], %91 {strides = array<i32>} : memref<400x128xf32, #tpu.memory_space<vmem>>, vector<8x128xf32>,
    %93 = vector.extract_strided_slice %4 {offsets = [0, 44], sizes = [8, 128], strides = [1, 1]} : vector<8x256xf32> to vector<8x128xf32>
    %c352 = arith.constant 352 : index
    %c0_50 = arith.constant 0 : index
    %94 = vector.load %arg7[%c352, %c0_50] : memref<400x128xf32, #tpu.memory_space<vmem>>, vector<8x128xf32>
    tpu.vector_store %arg7[%c352, %c0_50], %93 {strides = array<i32>} : memref<400x128xf32, #tpu.memory_space<vmem>>, vector<8x128xf32>,
    %95 = vector.extract_strided_slice %4 {offsets = [0, 45], sizes = [8, 128], strides = [1, 1]} : vector<8x256xf32> to vector<8x128xf32>
    %c360 = arith.constant 360 : index
    %c0_51 = arith.constant 0 : index
    %96 = vector.load %arg7[%c360, %c0_51] : memref<400x128xf32, #tpu.memory_space<vmem>>, vector<8x128xf32>
    tpu.vector_store %arg7[%c360, %c0_51], %95 {strides = array<i32>} : memref<400x128xf32, #tpu.memory_space<vmem>>, vector<8x128xf32>,
    %97 = vector.extract_strided_slice %4 {offsets = [0, 46], sizes = [8, 128], strides = [1, 1]} : vector<8x256xf32> to vector<8x128xf32>
    %c368 = arith.constant 368 : index
    %c0_52 = arith.constant 0 : index
    %98 = vector.load %arg7[%c368, %c0_52] : memref<400x128xf32, #tpu.memory_space<vmem>>, vector<8x128xf32>
    tpu.vector_store %arg7[%c368, %c0_52], %97 {strides = array<i32>} : memref<400x128xf32, #tpu.memory_space<vmem>>, vector<8x128xf32>,
    %99 = vector.extract_strided_slice %4 {offsets = [0, 47], sizes = [8, 128], strides = [1, 1]} : vector<8x256xf32> to vector<8x128xf32>
    %c376 = arith.constant 376 : index
    %c0_53 = arith.constant 0 : index
    %100 = vector.load %arg7[%c376, %c0_53] : memref<400x128xf32, #tpu.memory_space<vmem>>, vector<8x128xf32>
    tpu.vector_store %arg7[%c376, %c0_53], %99 {strides = array<i32>} : memref<400x128xf32, #tpu.memory_space<vmem>>, vector<8x128xf32>,
    %101 = vector.extract_strided_slice %4 {offsets = [0, 48], sizes = [8, 128], strides = [1, 1]} : vector<8x256xf32> to vector<8x128xf32>
    %c384 = arith.constant 384 : index
    %c0_54 = arith.constant 0 : index
    %102 = vector.load %arg7[%c384, %c0_54] : memref<400x128xf32, #tpu.memory_space<vmem>>, vector<8x128xf32>
    tpu.vector_store %arg7[%c384, %c0_54], %101 {strides = array<i32>} : memref<400x128xf32, #tpu.memory_space<vmem>>, vector<8x128xf32>,
    %103 = vector.extract_strided_slice %4 {offsets = [0, 49], sizes = [8, 128], strides = [1, 1]} : vector<8x256xf32> to vector<8x128xf32>
    %c392 = arith.constant 392 : index
    %c0_55 = arith.constant 0 : index
    %104 = vector.load %arg7[%c392, %c0_55] : memref<400x128xf32, #tpu.memory_space<vmem>>, vector<8x128xf32>
    tpu.vector_store %arg7[%c392, %c0_55], %103 {strides = array<i32>} : memref<400x128xf32, #tpu.memory_space<vmem>>, vector<8x128xf32>,
    %c0_56 = arith.constant 0 : index
    %c0_57 = arith.constant 0 : index
    %105 = vector.load %arg4[%c0_56, %c0_57] : memref<12x400xf32, #tpu.memory_space<vmem>>, vector<12x400xf32>
    %c0_58 = arith.constant 0 : index
    %c0_59 = arith.constant 0 : index
    %106 = vector.load %arg7[%c0_58, %c0_59] : memref<400x128xf32, #tpu.memory_space<vmem>>, vector<400x128xf32>
    %cst = arith.constant dense<0.000000e+00> : vector<12x128xf32>
    %107 = tpu.matmul %105, %106, %cst {dimension_numbers = #tpu.dot_dimension_numbers<[1], [0], [0], [1], [0, 0, 1, 1], [], []>} : vector<12x400xf32>, vector<400x128xf32>, vector<12x128xf32> -> vector<12x128xf32>
    %c0_60 = arith.constant 0 : index
    %c0_61 = arith.constant 0 : index
    %108 = vector.load %arg5[%c0_60, %c0_61] : memref<12x3xf32, #tpu.memory_space<vmem>>, vector<12x1xf32>
    %109 = vector.broadcast %108 : vector<12x1xf32> to vector<12x128xf32>
    %110 = arith.addf %107, %109 : vector<12x128xf32>
    %cst_62 = arith.constant 0.000000e+00 : f32
    %111 = vector.broadcast %cst_62 : f32 to vector<12x128xf32>
    %112 = arith.cmpf ogt, %110, %111 : vector<12x128xf32>
    %cst_63 = arith.constant 0.00999999977 : f32
    %113 = vector.broadcast %cst_63 : f32 to vector<12x128xf32>
    %114 = arith.mulf %113, %110 : vector<12x128xf32>
    %115 = arith.select %112, %110, %114 : vector<12x128xi1>, vector<12x128xf32>
    %c0_64 = arith.constant 0 : index
    %c1 = arith.constant 1 : index
    %116 = vector.load %arg5[%c0_64, %c1] : memref<12x3xf32, #tpu.memory_space<vmem>>, vector<12x1xf32>
    %117 = vector.broadcast %116 : vector<12x1xf32> to vector<12x128xf32>
    %118 = arith.mulf %115, %117 : vector<12x128xf32>
    %c0_65 = arith.constant 0 : index
    %c2 = arith.constant 2 : index
    %119 = vector.load %arg5[%c0_65, %c2] : memref<12x3xf32, #tpu.memory_space<vmem>>, vector<12x1xf32>
    %120 = vector.broadcast %119 : vector<12x1xf32> to vector<12x128xf32>
    %121 = arith.addf %118, %120 : vector<12x128xf32>
    %c0_66 = arith.constant 0 : index
    %c0_67 = arith.constant 0 : index
    %c0_68 = arith.constant 0 : index
    %122 = vector.load %arg6[%c0_66, %c0_67, %c0_68] : memref<1x12x128xf32, #tpu.memory_space<vmem>>, vector<1x12x128xf32>
    %123 = vector.shape_cast %122 : vector<1x12x128xf32> to vector<12x128xf32>
    %124 = vector.shape_cast %121 : vector<12x128xf32> to vector<1x12x128xf32>
    tpu.vector_store %arg6[%c0_66, %c0_67, %c0_68], %124 {strides = array<i32>} : memref<1x12x128xf32, #tpu.memory_space<vmem>>, vector<1x12x128xf32>,
    return
  }
  func.func @transform_0(%arg0: i32, %arg1: i32) -> (i32, i32, i32) {
    %c0_i32 = arith.constant 0 : i32
    %c0_i32_0 = arith.constant 0 : i32
    return %arg0, %c0_i32, %arg1 : i32, i32, i32
  }
  func.func @transform_1(%arg0: i32, %arg1: i32) -> (i32, i32, i32) {
    %c1_i32 = arith.constant 1 : i32
    %0 = arith.addi %arg1, %c1_i32 : i32
    %c1_i32_0 = arith.constant 1 : i32
    %1 = arith.muli %0, %c1_i32_0 : i32
    %c0_i32 = arith.constant 0 : i32
    %c0_i32_1 = arith.constant 0 : i32
    return %arg0, %c0_i32, %1 : i32, i32, i32
  }
  func.func @transform_2(%arg0: i32, %arg1: i32) -> (i32, i32) {
    %c0_i32 = arith.constant 0 : i32
    %c0_i32_0 = arith.constant 0 : i32
    %c0_i32_1 = arith.constant 0 : i32
    return %c0_i32, %c0_i32_0 : i32, i32
  }
  func.func @transform_3(%arg0: i32, %arg1: i32) -> (i32, i32) {
    %c0_i32 = arith.constant 0 : i32
    %c0_i32_0 = arith.constant 0 : i32
    %c0_i32_1 = arith.constant 0 : i32
    return %c0_i32, %c0_i32_0 : i32, i32
  }
  func.func @transform_4(%arg0: i32, %arg1: i32) -> (i32, i32, i32) {
    %c0_i32 = arith.constant 0 : i32
    %c0_i32_0 = arith.constant 0 : i32
    return %arg0, %c0_i32, %arg1 : i32, i32, i32
  }
}

</mosaic_0001>

<bundles_post_ra>
// kernel: tpu_custom_call.1
= control target key start
LH: loop header
LB: loop body
LE: loop exit
PB: predicated region body
PF: predicated region fallthrough
CT: control target
= control target key end

     0   :  { %s1910_s0 = inlined_call_operand.hbm [shape: f32[2,8,256], index: 0, kind: input, shape index: {}]   ;;  %s1911_s1 = inlined_call_operand.hbm [shape: f32[2,8,256], index: 1, kind: input, shape index: {}]   ;;  %s1912_s2 = inlined_call_operand.hbm [shape: f32[12,400], index: 2, kind: input, shape index: {}]   ;;  %s1913_s3 = inlined_call_operand.vmem [shape: f32[12,3], index: 3, kind: input, shape index: {}]   ;;  %s1914_s4 = inlined_call_operand.vmem [shape: f32[2,12,128], index: 4, kind: output, shape index: {}]  }
   0x1   :  { %1917 = sst [smem:[#allocation12_spill]] %s1912_s2 }
   0x2   :  { %9 = vsyncpa [#allocation4], 0 }
   0x3   :  { %11 = vsyncpa [#allocation4 + $0x1], 0 }
   0x4   :  { %12 = vsyncpa [#allocation6], 0 }
   0x5   :  { %14 = vsyncpa [#allocation6 + $0x1], 0  ;;  %s1655_s15 = smov 0   ;;  %s1657_s16 = smov 0  }
   0x6   :  { %s1659_s17 = smov 0   ;;  %s1661_s18 = smov 0  }
   0x7   :  { %s1663_s19 = smov 0   ;;  %s1665_s20 = smov 0  }
   0x8 LB: > { %s1915_s21 = sadd.s32 4294967295, %s1573_s20   ;;  %p1026_p0 = scmp.ge.s32.totalorder %s1573_s20, 1  ;;  %s1573_s20 = sphi %s1665_s20, %s20_s20   ;;  %s1569_s19 = sphi %s1663_s19, %s1930_s19   ;;  %s1565_s18 = sphi %s1661_s18, %s1929_s18   ;;  %s1561_s17 = sphi %s1659_s17, %s1928_s17   ;;  %s1557_s16 = sphi %s1657_s16, %s1927_s16   ;;  %s1553_s15 = sphi %s1655_s15, %s1926_s15  }
   0x9   : > { %p1689_p1 = scmp.eq.s32.totalorder %s1915_s21, 0  ;;  %p165_p2 = scmp.lt.s32.totalorder %s1573_s20, 3 }
   0xa   : > { %s1919_s2 = sld [smem:[#allocation12_spill]]  ;;  %s1575_s27 = smov [#allocation7]  }
   0xb   : > { %p1697_p3 = pnand %p1026_p0, %p165_p2  ;;  %s178_s28 = sshll.u32 %s1575_s27, 4  ;;  %s179_s28 = int_to_ptr.vmem [resolvable:$true] %s178_s28 }
   0xc   : > { %s1576_s29 = smov 512   ;;  %s1577_s30 = smov 32  }
   0xd   : > { %p1056_p4 = pneg %p1697_p3  ;;  %s32_s5 = sadd.s32 1, %s1569_s19 }
   0xe   : > { %p34_p6 = scmp.ge.s32.totalorder %s32_s5, 2  ;;  %s41_s6 = sadd.s32 1, %s1561_s17 }
   0xf   : > { %p1057_p5 = pnand %p1056_p4, %p1689_p1  ;;  %p48_p7 = scmp.ne.s32.totalorder %s1561_s17, %s1557_s16 }
  0x10   : > { %s176_s25 = sshll.u32 %s1919_s2, 4  ;;  %p49_p8 = scmp.eq.s32.totalorder %s1573_s20, 0  ;;  %s177_s25 = int_to_ptr.hbm [resolvable:$true] %s176_s25 }
  0x11   : > { %1059 = dma.hbm_to_vmem [thread:$0]  (!%p1057_p5), %s177_s25, 1024, %s179_s28, [#allocation6], %s1576_s29, %s1576_s29, %s1577_s30  }
  0x12   : > { %s1932_s5 = smov (%p34_p6, %s32_s5), 0  ;;  %p1712_p9 = por %p49_p8, %p48_p7 }
  0x13   : > { %1921 = sst [smem:[#allocation11_spill]] %s1932_s5  ;;  %p54_p10 = scmp.ne.s32.totalorder %s1557_s16, %s1553_s15 }
  0x14   : > { %s36_s8 = ssub.s32 %s1569_s19, %s1932_s5  ;;  %p1068_p11 = scmp.lt.s32.totalorder %s1573_s20, 2 }
  0x15   : > { %p39_p12 = scmp.eq.s32.totalorder %s36_s8, 0  ;;  %p1723_p13 = por %p1689_p1, %p54_p10 }
  0x16   : > { %s195_s10 = sand.u32 1, %s1561_s17   ;;  %s1045_s11 = sshll.u32 %s1569_s19, 4 }
  0x17   : > { %s1730_s12 = scalar_select %p39_p12, %s1561_s17, %s41_s6  }
  0x18   : > { %s1029_s13 = sshll.u32 %s195_s10, 3  ;;  %s205_s24 = scalar_lea.hbm %s1910_s0, %s1045_s11 }
  0x19   : > { %s207_s25 = sshll.u32 %s205_s24, 4  ;;  %s199_s15 = scalar_lea.vmem [#allocation3], %s1029_s13  ;;  %s208_s25 = int_to_ptr.hbm [resolvable:$true] %s207_s25 }
  0x1a   : > { %s209_s27 = sshll.u32 %s199_s15, 4  ;;  %p1061_p0 = pnand %p1068_p11, %p1712_p9  ;;  %s210_s27 = int_to_ptr.vmem [resolvable:$true] %s209_s27 }
  0x1b   : > { %s944_s30 = scalar_lea.hbm %s1911_s1, %s1045_s11  ;;  %s216_s8 = sand.u32 1, %s1573_s20  }
  0x1c   : > { %s196_s6 = scalar_lea.sflag [#allocation4], %s195_s10  ;;  %s945_s21 = scalar_lea.hbm %s944_s30, 8 }
  0x1d   : > { %1063 = dma.hbm_to_vmem [thread:$0]  (!%p1061_p0), %s208_s25, 128, %s210_s27, %s196_s6  }
  0x1e   : > { %s220_s2 = scalar_lea.vmem [#allocation5], %s1029_s13  ;;  %s229_s14 = sshll.u32 %s945_s21, 4  ;;  %s230_s14 = int_to_ptr.hbm [resolvable:$true] %s229_s14 }
  0x1f   : > { %s231_s5 = sshll.u32 %s220_s2, 4  ;;  %s217_s23 = scalar_lea.sflag [#allocation6], %s216_s8  ;;  %s232_s5 = int_to_ptr.vmem [resolvable:$true] %s231_s5 }
  0x20   : > { %1066 = dma.hbm_to_vmem [thread:$0]  (!%p1061_p0), %s230_s14, 128, %s232_s5, %s217_s23  }
  0x21   : > { %240 = sbr.rel (%p1697_p3) target bundleno = 445 (0x1bd), region = 36  ;;  %s242_s7 = sand.u32 (!%p1697_p3), 1, %s1557_s16  }
  0x22   : > { %s1036_s24 = sshll.u32 (!%p1697_p3), %s242_s7, 3  ;;  %s243_s15 = scalar_lea.sflag (!%p1697_p3), [#allocation4], %s242_s7 }
  0x23   : > { %s246_s11 = scalar_lea.vmem (!%p1697_p3), [#allocation3], %s1036_s24 }
  0x26   : > { %1540 = dma.done.wait (%p1723_p13), %s243_s15, 128  }
  0x27   : > { %1542 = vsyncadd (%p1723_p13), %s243_s15, 4294967168  ;;  %s1924_s2 = sadd.s32 4294967295, %s1573_s20   ;;  %s256_s5 = scalar_lea.vmem [#allocation5], %s1036_s24 }
  0x28   : > { %s252_s21 = sand.u32 1, %s1924_s2  }
  0x29   : > { %s253_s10 = scalar_lea.sflag [#allocation6], %s252_s21 }
  0x2a   : > { %1544 = dma.done.wait (%p1723_p13), %s253_s10, 128  }
  0x2b   : > { %1546 = vsyncadd (%p1723_p13), %s253_s10, 4294967168 }
  0x2c   : > { %1548 = dma.done.wait (%p1689_p1), [#allocation6], 1024  }
  0x2d   : > { %1550 = vsyncadd (%p1689_p1), [#allocation6], 4294966272  ;;  %v1760_v0 = vld [vmem:[%s246_s11] sm:$0xff]  ;;  %v305_v1 = vld [vmem:[%s256_s5] sm:$0xff]  ;;  %s1578_s26 = smov 125   ;;  %s1579_s13 = smov 127  }
  0x2e   : > { %v1763_v2 = vpack.i.bf16 %v305_v1, %v1760_v0  ;;  %s1580_s9 = smov 123   ;;  %s1581_s25 = smov 124   ;;  %vm425_vm0 = vcmask 924672   ;;  %vm553_vm1 = vcmask 793600   ;;  %vm417_vm2 = vcmask 932864  }
  0x2f   : > { %s1582_s22 = smov 126   ;;  %s1583_s27 = smov 122   ;;  %vm409_vm3 = vcmask 941056   ;;  %vm401_vm4 = vcmask 949248   ;;  %vm393_vm5 = vcmask 957440   ;;  %vm385_vm6 = vcmask 965632  }
  0x30   : > { %1184 = vrot.lane.b32.xlu1 %v1763_v2, %s1578_s26  ;;  %1174 = vrot.lane.b32.xlu0 %v1763_v2, %s1579_s13  ;;  %s1584_s28 = smov 120   ;;  %s1585_s29 = smov 121   ;;  %vm377_vm7 = vcmask 973824   ;;  %vm369_vm8 = vcmask 982016   ;;  %vm361_vm9 = vcmask 990208   ;;  %vm353_vm10 = vcmask 998400  }
  0x31   : > { %1194 = vrot.lane.b32.xlu2 %v1763_v2, %s1580_s9  ;;  %s1586_s30 = smov 119   ;;  %s1587_s8 = smov 117   ;;  %vm681_vm11 = vcmask 662528   ;;  %vm673_vm12 = vcmask 670720   ;;  %vm345_vm13 = vcmask 1006592   ;;  %vm337_vm14 = vcmask 1014784  }
  0x32   : > { %s1588_s6 = smov 118   ;;  %s1589_s14 = smov 116   ;;  %vm329_vm15 = vcmask 1022976  }
  0x33   : > { %s1590_s23 = smov 114   ;;  %s1591_s7 = smov 115  }
  0x34   : > { %s1592_s24 = smov 113   ;;  %s1593_s15 = smov 112  }
  0x35   : > { %s1594_s11 = smov 111   ;;  %s1595_s2 = smov 110  }
  0x36   : > { %s1596_s21 = smov 81   ;;  %s1597_s10 = smov 82  }
  0x37   : > { %s1598_s5 = smov 97   ;;  %s1599_s26 = smov 83  }
  0x38   : > { %1189 = vrot.lane.b32.xlu1 %v1763_v2, %s1581_s25  ;;  %1179 = vrot.lane.b32.xlu0 %v1763_v2, %s1582_s22  ;;  %s1600_s13 = smov 98   ;;  %s1601_s9 = smov 84  }
  0x39   : > { %1199 = vrot.lane.b32.xlu2 %v1763_v2, %s1583_s27  ;;  %s1602_s25 = smov 99   ;;  %s1603_s22 = smov 85  }
  0x3a   : > { %s1604_s27 = smov 100   ;;  %p296_p1 = scmp.lt.s32.totalorder %s1565_s18, 1 }
  0x3c   : > { %s1934_s18 = smov (!%p296_p1, %s1565_s18), 1 }
  0x40   : > { %1209 = vrot.lane.b32.xlu1 %v1763_v2, %s1584_s28  ;;  %1204 = vrot.lane.b32.xlu0 %v1763_v2, %s1585_s29  ;;  %s1605_s28 = smov 86   ;;  %s1606_s29 = smov 101  }
  0x41   : > { %1214 = vrot.lane.b32.xlu2 %v1763_v2, %s1586_s30  ;;  %s1607_s30 = smov 87  }
  0x48   : > { %1224 = vrot.lane.b32.xlu1 %v1763_v2, %s1587_s8  ;;  %1219 = vrot.lane.b32.xlu0 %v1763_v2, %s1588_s6  ;;  %s1608_s8 = smov 102   ;;  %s1609_s6 = smov 88  }
  0x49   : > { %1229 = vrot.lane.b32.xlu2 %v1763_v2, %s1589_s14  ;;  %s1610_s14 = smov 103  }
  0x50   : > { %1239 = vrot.lane.b32.xlu1 %v1763_v2, %s1590_s23  ;;  %1234 = vrot.lane.b32.xlu0 %v1763_v2, %s1591_s7  ;;  %s1611_s23 = smov 89   ;;  %s1612_s7 = smov 104  }
  0x51   : > { %1244 = vrot.lane.b32.xlu2 %v1763_v2, %s1592_s24  ;;  %s1613_s24 = smov 90  }
  0x58   : > { %1249 = vrot.lane.b32.xlu0 %v1763_v2, %s1593_s15  ;;  %1254 = vrot.lane.b32.xlu1 %v1763_v2, %s1594_s11  ;;  %s1614_s15 = smov 105   ;;  %s1615_s11 = smov 91  }
  0x59   : > { %1259 = vrot.lane.b32.xlu2 %v1763_v2, %s1595_s2  ;;  %s1616_s2 = smov 106  }
  0x60   : > { %1264 = vrot.lane.b32.xlu0 %v1763_v2, %s1596_s21  ;;  %1269 = vrot.lane.b32.xlu1 %v1763_v2, %s1597_s10  ;;  %s1617_s21 = smov 92   ;;  %s1618_s10 = smov 107  }
  0x61   : > { %1274 = vrot.lane.b32.xlu2 %v1763_v2, %s1598_s5  ;;  %s1619_s5 = smov 93  }
  0x68   : > { %1279 = vrot.lane.b32.xlu0 %v1763_v2, %s1599_s26  ;;  %1284 = vrot.lane.b32.xlu1 %v1763_v2, %s1600_s13  ;;  %s1620_s26 = smov 108   ;;  %s1621_s13 = smov 94  }
  0x69   : > { %1289 = vrot.lane.b32.xlu2 %v1763_v2, %s1601_s9  ;;  %s1622_s9 = smov 109  }
  0x70   : > { %1294 = vrot.lane.b32.xlu0 %v1763_v2, %s1602_s25  ;;  %1299 = vrot.lane.b32.xlu1 %v1763_v2, %s1603_s22  ;;  %s1623_s25 = smov 95   ;;  %s1624_s22 = smov 96  }
  0x71   : > { %1304 = vrot.lane.b32.xlu2 %v1763_v2, %s1604_s27  ;;  %s1625_s27 = smov 79  }
  0x78   : > { %1309 = vrot.lane.b32.xlu0 %v1763_v2, %s1605_s28  ;;  %1314 = vrot.lane.b32.xlu1 %v1763_v2, %s1606_s29  ;;  %s1626_s28 = smov 80  }
  0x79   : > { %1319 = vrot.lane.b32.xlu2 %v1763_v2, %s1607_s30 }
  0x80   : > { %1324 = vrot.lane.b32.xlu0 %v1763_v2, %s1608_s8  ;;  %1329 = vrot.lane.b32.xlu1 %v1763_v2, %s1609_s6 }
  0x81   : > { %1334 = vrot.lane.b32.xlu2 %v1763_v2, %s1610_s14  ;;  %s1047_s14 = sshll.u32 %s1934_s18, 4 }
  0x88   : > { %1339 = vrot.lane.b32.xlu0 %v1763_v2, %s1611_s23  ;;  %1344 = vrot.lane.b32.xlu1 %v1763_v2, %s1612_s7 }
  0x89   : > { %1349 = vrot.lane.b32.xlu2 %v1763_v2, %s1613_s24  ;;  %s303_s24 = scalar_lea.vmem %s1914_s4, %s1047_s14 }
  0x8b   : > { %v1801_v3 = vpop.permute.xlu2 %1194 }
  0x8c   : > { %v1197_v54 = vunpack.i.h.bf16 %v1801_v3  ;;  %v1196_v56 = vunpack.i.l.bf16 %v1801_v3 }
  0x90   : > { %1354 = vrot.lane.b32.xlu0 %v1763_v2, %s1614_s15  ;;  %1359 = vrot.lane.b32.xlu1 %v1763_v2, %s1615_s11 }
  0x91   : > { %1364 = vrot.lane.b32.xlu2 %v1763_v2, %s1616_s2 }
  0x93   : > { %v1806_v4 = vpop.permute.xlu2 %1199 }
  0x94   : > { %v1202_v52 = vunpack.i.h.bf16 %v1806_v4  ;;  %v1201_v53 = vunpack.i.l.bf16 %v1806_v4 }
  0x98   : > { %1369 = vrot.lane.b32.xlu0 %v1763_v2, %s1617_s21  ;;  %1374 = vrot.lane.b32.xlu1 %v1763_v2, %s1618_s10 }
  0x99   : > { %1379 = vrot.lane.b32.xlu2 %v1763_v2, %s1619_s5 }
  0x9b   : > { %v1811_v5 = vpop.permute.xlu2 %1214 }
  0x9c   : > { %v1217_v42 = vunpack.i.h.bf16 %v1811_v5  ;;  %v1216_v43 = vunpack.i.l.bf16 %v1811_v5 }
  0x9e   : > { %v378_v51 = vsel %vm377_vm7, %v1216_v43, %v1217_v42  ;;  %vm649_vm7 = vcmask 695296  }
  0xa0   : > { %1384 = vrot.lane.b32.xlu0 %v1763_v2, %s1620_s26  ;;  %1389 = vrot.lane.b32.xlu1 %v1763_v2, %s1621_s13 }
  0xa1   : > { %1394 = vrot.lane.b32.xlu2 %v1763_v2, %s1622_s9 }
  0xa2   : > { %v1816_v6 = vpop.permute.xlu1 %1184  ;;  %v1818_v7 = vpop.permute.xlu0 %1174 }
  0xa3   : > { %v1230_v8 = vpop.permute.xlu2 %1229 }
  0xa4   : > { %v1232_v31 = vunpack.i.h.bf16 %v1230_v8  ;;  %v1231_v32 = vunpack.i.l.bf16 %v1230_v8 }
  0xa6   : > { %v402_v39 = vsel %vm401_vm4, %v1231_v32, %v1232_v31  ;;  %vm313_vm4 = vcmask 1039360  }
  0xa8   : > { %1399 = vrot.lane.b32.xlu0 %v1763_v2, %s1623_s25  ;;  %1404 = vrot.lane.b32.xlu1 %v1763_v2, %s1624_s22 }
  0xa9   : > { %1409 = vrot.lane.b32.xlu2 %v1763_v2, %s1625_s27 }
  0xaa   : > { %v1823_v9 = vpop.permute.xlu1 %1189  ;;  %v1825_v10 = vpop.permute.xlu0 %1179 }
  0xab   : > { %v1245_v11 = vpop.permute.xlu2 %1244  ;;  %v1192_v4 = vunpack.i.h.bf16 %v1823_v9  ;;  %v1191_v5 = vunpack.i.l.bf16 %v1823_v9  ;;  %v1181_v9 = vunpack.i.l.bf16 %v1825_v10 }
  0xac   : > { %v1247_v12 = vunpack.i.h.bf16 %v1245_v11  ;;  %v1246_v13 = vunpack.i.l.bf16 %v1245_v11  ;;  %v1187_v11 = vunpack.i.h.bf16 %v1816_v6 }
  0xae   : > { %v426_v14 = vsel %vm425_vm0, %v1246_v13, %v1247_v12  ;;  %v1186_v12 = vunpack.i.l.bf16 %v1816_v6  ;;  %v346_v13 = vsel %vm345_vm13, %v1196_v56, %v1197_v54  ;;  %vm321_vm0 = vcmask 1031168  }
  0xaf   : > { %778 = vmatpush.msra.mxu0 %v426_v14  ;;  %v1177_v14 = vunpack.i.h.bf16 %v1818_v7  ;;  %vm625_vm13 = vcmask 719872  }
  0xb0   : > { %1414 = vrot.lane.b32.xlu0 %v1763_v2, %s1626_s28  ;;  %v354_v2 = vsel %vm353_vm10, %v1201_v53, %v1202_v52  ;;  %vm633_vm10 = vcmask 711680  }
  0xb2   : > { %v1210_v15 = vpop.permute.xlu1 %1209  ;;  %v1205_v16 = vpop.permute.xlu0 %1204 }
  0xb3   : > { %v1828_v17 = vpop.permute.xlu2 %1259  ;;  %v1212_v46 = vunpack.i.h.bf16 %v1210_v15  ;;  %v1211_v47 = vunpack.i.l.bf16 %v1210_v15  ;;  %v1207_v49 = vunpack.i.h.bf16 %v1205_v16  ;;  %v1206_v50 = vunpack.i.l.bf16 %v1205_v16 }
  0xb4   : > { %v1176_v15 = vunpack.i.l.bf16 %v1818_v7  ;;  %v1182_v16 = vunpack.i.h.bf16 %v1825_v10 }
  0xb5   : > { %v370_v55 = vsel %vm369_vm8, %v1211_v47, %v1212_v46  ;;  %v362_v58 = vsel %vm361_vm9, %v1206_v50, %v1207_v49  ;;  %vm641_vm8 = vcmask 703488   ;;  %vm521_vm9 = vcmask 826368  }
  0xb6   : > { %v322_v10 = vsel %vm321_vm0, %v1181_v9, %v1182_v16  ;;  %vm609_vm0 = vcmask 736256  }
  0xba   : > { %v1225_v18 = vpop.permute.xlu1 %1224  ;;  %v1220_v19 = vpop.permute.xlu0 %1219 }
  0xbb   : > { %v1275_v20 = vpop.permute.xlu2 %1274  ;;  %v1227_v34 = vunpack.i.h.bf16 %v1225_v18  ;;  %v1226_v35 = vunpack.i.l.bf16 %v1225_v18  ;;  %v1222_v37 = vunpack.i.h.bf16 %v1220_v19  ;;  %v1221_v38 = vunpack.i.l.bf16 %v1220_v19 }
  0xbc   : > { %v1277_v21 = vunpack.i.h.bf16 %v1275_v20  ;;  %v1276_v22 = vunpack.i.l.bf16 %v1275_v20  ;;  %v338_v18 = vsel %vm337_vm14, %v1191_v5, %v1192_v4  ;;  %vm617_vm14 = vcmask 728064  }
  0xbd   : > { %v394_v44 = vsel %vm393_vm5, %v1226_v35, %v1227_v34  ;;  %v386_v48 = vsel %vm385_vm6, %v1221_v38, %v1222_v37  ;;  %vm537_vm5 = vcmask 809984   ;;  %vm529_vm6 = vcmask 818176  }
  0xbe   : > { %v554_v23 = vsel %vm553_vm1, %v1276_v22, %v1277_v21  ;;  %v330_v21 = vsel %vm329_vm15, %v1186_v12, %v1187_v11  ;;  %vm665_vm1 = vcmask 678912   ;;  %vm497_vm15 = vcmask 850944  }
  0xbf   : > { %801 = vmatpush.msra.mxu1 %v554_v23 }
  0xc2   : > { %v1240_v24 = vpop.permute.xlu1 %1239  ;;  %v1235_v25 = vpop.permute.xlu0 %1234 }
  0xc3   : > { %v1242_v26 = vunpack.i.h.bf16 %v1240_v24  ;;  %v1241_v27 = vunpack.i.l.bf16 %v1240_v24  ;;  %v1237_v28 = vunpack.i.h.bf16 %v1235_v25  ;;  %v1236_v29 = vunpack.i.l.bf16 %v1235_v25  ;;  %v1830_v30 = vpop.permute.xlu2 %1289 }
  0xc4   : > { %v1292_v19 = vunpack.i.h.bf16 %v1830_v30  ;;  %v1291_v6 = vunpack.i.l.bf16 %v1830_v30  ;;  %v314_v30 = vsel %vm313_vm4, %v1176_v15, %v1177_v14  ;;  %vm697_vm4 = vcmask 646144  }
  0xc5   : > { %v418_v33 = vsel %vm417_vm2, %v1241_v27, %v1242_v26  ;;  %v410_v36 = vsel %vm409_vm3, %v1236_v29, %v1237_v28  ;;  %vm545_vm2 = vcmask 801792   ;;  %vm657_vm3 = vcmask 687104  }
  0xc6   : > { %779 = vmatpush.msra.mxu0 %v418_v33  ;;  %v658_v29 = vsel %vm657_vm3, %v1291_v6, %v1292_v19  ;;  %vm601_vm3 = vcmask 744448  }
  0xc8   : > { %780 = vmatpush.msra.mxu0 %v410_v36 }
  0xca   : > { %v1832_v40 = vpop.permute.xlu0 %1249  ;;  %781 = vmatpush.msra.mxu0 %v402_v39  ;;  %v1834_v41 = vpop.permute.xlu1 %1254 }
  0xcb   : > { %v1838_v45 = vpop.permute.xlu2 %1304 }
  0xcc   : > { %782 = vmatpush.msra.mxu0 %v394_v44  ;;  %v1307_v31 = vunpack.i.h.bf16 %v1838_v45  ;;  %v1306_v32 = vunpack.i.l.bf16 %v1838_v45 }
  0xce   : > { %783 = vmatpush.msra.mxu0 %v386_v48  ;;  %v530_v43 = vsel %vm529_vm6, %v1306_v32, %v1307_v31  ;;  %vm473_vm6 = vcmask 875520  }
  0xd0   : > { %784 = vmatpush.msra.mxu0 %v378_v51 }
  0xd2   : > { %v1265_v57 = vpop.permute.xlu0 %1264  ;;  %785 = vmatpush.msra.mxu0 %v370_v55  ;;  %v1270_v59 = vpop.permute.xlu1 %1269 }
  0xd3   : > { %v1267_v60 = vunpack.i.h.bf16 %v1265_v57  ;;  %v1266_v61 = vunpack.i.l.bf16 %v1265_v57  ;;  %v1272_v62 = vunpack.i.h.bf16 %v1270_v59  ;;  %v1271_v63 = vunpack.i.l.bf16 %v1270_v59  ;;  %v1844_v1 = vpop.permute.xlu2 %1319 }
  0xd4   : > { %786 = vmatpush.msra.mxu0 %v362_v58  ;;  %v1322_v45 = vunpack.i.h.bf16 %v1844_v1  ;;  %v1321_v46 = vunpack.i.l.bf16 %v1844_v1 }
  0xd5   : > { %v682_v3 = vsel %vm681_vm11, %v1266_v61, %v1267_v60  ;;  %v674_v8 = vsel %vm673_vm12, %v1271_v63, %v1272_v62  ;;  %vm513_vm11 = vcmask 834560   ;;  %vm505_vm12 = vcmask 842752  }
  0xd6   : > { %787 = vmatpush.msra.mxu0 %v354_v2  ;;  %824 = vmatpush.msra.mxu2 %v682_v3  ;;  %v634_v55 = vsel %vm633_vm10, %v1321_v46, %v1322_v45  ;;  %vm577_vm10 = vcmask 769024  }
  0xd8   : > { %788 = vmatpush.msra.mxu0 %v346_v13  ;;  %825 = vmatpush.msra.mxu2 %v674_v8 }
  0xda   : > { %v1280_v20 = vpop.permute.xlu0 %1279  ;;  %789 = vmatpush.msra.mxu0 %v338_v18  ;;  %v1285_v22 = vpop.permute.xlu1 %1284 }
  0xdb   : > { %v1282_v7 = vunpack.i.h.bf16 %v1280_v20  ;;  %v1281_v23 = vunpack.i.l.bf16 %v1280_v20  ;;  %v1287_v24 = vunpack.i.h.bf16 %v1285_v22  ;;  %v1286_v25 = vunpack.i.l.bf16 %v1285_v22  ;;  %v1856_v26 = vpop.permute.xlu2 %1334 }
  0xdc   : > { %790 = vmatpush.msra.mxu0 %v330_v21  ;;  %v1337_v56 = vunpack.i.h.bf16 %v1856_v26  ;;  %v1336_v57 = vunpack.i.l.bf16 %v1856_v26 }
  0xdd   : > { %v666_v27 = vsel %vm665_vm1, %v1281_v23, %v1282_v7  ;;  %v546_v28 = vsel %vm545_vm2, %v1286_v25, %v1287_v24  ;;  %vm489_vm1 = vcmask 859136   ;;  %vm481_vm2 = vcmask 867328  }
  0xde   : > { %791 = vmatpush.msra.mxu0 %v322_v10  ;;  %826 = vmatpush.msra.mxu2 %v666_v27  ;;  %v506_v4 = vsel %vm505_vm12, %v1336_v57, %v1337_v56  ;;  %vm441_vm12 = vcmask 908288  }
  0xdf   : > { %802 = vmatpush.msra.mxu1 %v546_v28 }
  0xe0   : > { %792 = vmatpush.msra.mxu0 %v314_v30  ;;  %827 = vmatpush.msra.mxu2 %v658_v29 }
  0xe2   : > { %v1295_v33 = vpop.permute.xlu0 %1294  ;;  %v1300_v34 = vpop.permute.xlu1 %1299  ;;  %793 = vmatpush.msra.mxu0 %v1760_v0 }
  0xe3   : > { %v1297_v35 = vunpack.i.h.bf16 %v1295_v33  ;;  %v1296_v36 = vunpack.i.l.bf16 %v1295_v33  ;;  %v1302_v37 = vunpack.i.h.bf16 %v1300_v34  ;;  %v1301_v38 = vunpack.i.l.bf16 %v1300_v34  ;;  %v1350_v39 = vpop.permute.xlu2 %1349  ;;  %v701_v33 = vld [vmem:[#allocation7] sm:$0xff] }
  0xe4   : > { %v1352_v3 = vunpack.i.h.bf16 %v1350_v39  ;;  %v1351_v8 = vunpack.i.l.bf16 %v1350_v39  ;;  %794 = vmatmul.f32.vlgmr.msra.gmra.mxu0 %v701_v33 }
  0xe5   : > { %v538_v42 = vsel %vm537_vm5, %v1296_v36, %v1297_v35  ;;  %v650_v44 = vsel %vm649_vm7, %v1301_v38, %v1302_v37  ;;  %vm593_vm5 = vcmask 752640   ;;  %vm585_vm7 = vcmask 760832  }
  0xe6   : > { %803 = vmatpush.msra.mxu1 %v538_v42  ;;  %828 = vmatpush.msra.mxu2 %v650_v44  ;;  %v610_v6 = vsel %vm609_vm0, %v1351_v8, %v1352_v3  ;;  %v705_v44 = vld [vmem:[#allocation7 + $0x20] sm:$0xf]  ;;  %vm689_vm0 = vcmask 654336  }
  0xe8   : > { %804 = vmatpush.msra.mxu1 %v530_v43 }
  0xea   : > { %v1310_v47 = vpop.permute.xlu0 %1309  ;;  %v1315_v48 = vpop.permute.xlu1 %1314 }
  0xeb   : > { %v1312_v0 = vunpack.i.h.bf16 %v1310_v47  ;;  %v1311_v49 = vunpack.i.l.bf16 %v1310_v47  ;;  %v1317_v50 = vunpack.i.h.bf16 %v1315_v48  ;;  %v1316_v51 = vunpack.i.l.bf16 %v1315_v48  ;;  %v1365_v52 = vpop.permute.xlu2 %1364  ;;  %v759_v48 = vld [vmem:[%s1913_s3] sm:$0xff] }
  0xec   : > { %v1367_v20 = vunpack.i.h.bf16 %v1365_v52  ;;  %v1366_v21 = vunpack.i.l.bf16 %v1365_v52  ;;  %797 = vmatmul.f32.gmra.mxu0 %v705_v44 }
  0xed   : > { %v642_v53 = vsel %vm641_vm8, %v1311_v49, %v1312_v0  ;;  %v522_v54 = vsel %vm521_vm9, %v1316_v51, %v1317_v50  ;;  %v1627_v0 = vmov 0   ;;  %v1628_v51 = vmov 1  }
  0xee   : > { %829 = vmatpush.msra.mxu2 %v642_v53  ;;  %805 = vmatpush.msra.mxu1 %v522_v54  ;;  %v482_v30 = vsel %vm481_vm2, %v1366_v21, %v1367_v20  ;;  %vm465_vm8 = vcmask 883712   ;;  %vm457_vm9 = vcmask 891904   ;;  %v760_v54 = vld [vmem:[%s1913_s3 + $0x8] sm:$0xf] }
  0xef   : > { %1418 = vset.pattern.permute.xlu1 %v1627_v0  ;;  %1420 = vset.pattern.permute.xlu0 %v1628_v51 }
  0xf0   : > { %830 = vmatpush.msra.mxu2 %v634_v55  ;;  %763 = vperm.xlu1 %1418, %v759_v48  }
  0xf1   : > { %877 = vperm.xlu0 %1420, %v759_v48   ;;  %1419 = vset.pattern.permute.xlu2 %v1627_v0 }
  0xf2   : > { %v1325_v58 = vpop.permute.xlu0 %1324  ;;  %v1330_v59 = vpop.permute.xlu1 %1329  ;;  %768 = vperm.xlu2 %1419, %v760_v54  }
  0xf3   : > { %v1327_v60 = vunpack.i.h.bf16 %v1325_v58  ;;  %v1326_v61 = vunpack.i.l.bf16 %v1325_v58  ;;  %v1332_v62 = vunpack.i.h.bf16 %v1330_v59  ;;  %v1331_v63 = vunpack.i.l.bf16 %v1330_v59  ;;  %v1866_v1 = vpop.permute.xlu2 %1379 }
  0xf4   : > { %v1382_v34 = vunpack.i.h.bf16 %v1866_v1  ;;  %v1381_v35 = vunpack.i.l.bf16 %v1866_v1  ;;  %v1262_v59 = vunpack.i.h.bf16 %v1828_v17  ;;  %v1257_v1 = vunpack.i.h.bf16 %v1834_v41 }
  0xf5   : > { %v514_v2 = vsel %vm513_vm11, %v1326_v61, %v1327_v60  ;;  %v626_v5 = vsel %vm625_vm13, %v1331_v63, %v1332_v62  ;;  %v1261_v60 = vunpack.i.l.bf16 %v1828_v17  ;;  %vm449_vm11 = vcmask 900096  }
  0xf6   : > { %806 = vmatpush.msra.mxu1 %v514_v2  ;;  %831 = vmatpush.msra.mxu2 %v626_v5  ;;  %v586_v47 = vsel %vm585_vm7, %v1381_v35, %v1382_v34  ;;  %v1256_v2 = vunpack.i.l.bf16 %v1834_v41  ;;  %v1251_v5 = vunpack.i.l.bf16 %v1832_v40  ;;  %vm433_vm13 = vcmask 916480  }
  0xf7   : > { %v450_v3 = vsel %vm449_vm11, %v1261_v60, %v1262_v59 }
  0xf8   : > { %807 = vmatpush.msra.mxu1 %v506_v4  ;;  %v1252_v4 = vunpack.i.h.bf16 %v1832_v40  ;;  %1421 = vset.pattern.permute.xlu1 %v1628_v51  ;;  %v442_v8 = vsel %vm441_vm12, %v1256_v2, %v1257_v1 }
  0xf9   : > { %881 = vperm.xlu1 %1421, %v760_v54  }
  0xfa   : > { %v1340_v11 = vpop.permute.xlu0 %1339  ;;  %v1345_v12 = vpop.permute.xlu1 %1344  ;;  %v434_v40 = vsel %vm433_vm13, %v1251_v5, %v1252_v4 }
  0xfb   : > { %v1342_v13 = vunpack.i.h.bf16 %v1340_v11  ;;  %v1341_v14 = vunpack.i.l.bf16 %v1340_v11  ;;  %v1347_v15 = vunpack.i.h.bf16 %v1345_v12  ;;  %v1346_v16 = vunpack.i.l.bf16 %v1345_v12  ;;  %v1868_v9 = vpop.permute.xlu2 %1394 }
  0xfc   : > { %v1397_v49 = vunpack.i.h.bf16 %v1868_v9  ;;  %v1396_v50 = vunpack.i.l.bf16 %v1868_v9 }
  0xfd   : > { %v618_v18 = vsel %vm617_vm14, %v1341_v14, %v1342_v13  ;;  %v498_v19 = vsel %vm497_vm15, %v1346_v16, %v1347_v15  ;;  %vm569_vm14 = vcmask 777216   ;;  %vm561_vm15 = vcmask 785408   ;;  %v702_v16 = vld [vmem:[#allocation7 + $0x8] sm:$0xff] }
  0xfe   : > { %832 = vmatpush.msra.mxu2 %v618_v18  ;;  %808 = vmatpush.msra.mxu1 %v498_v19  ;;  %v458_v62 = vsel %vm457_vm9, %v1396_v50, %v1397_v49  ;;  %v1629_v15 = vmov 2   ;;  %v703_v19 = vld [vmem:[#allocation7 + $0x10] sm:$0xff] }
  0xff   : > { %1422 = vset.pattern.permute.xlu2 %v1629_v15  ;;  %1424 = vset.pattern.permute.xlu0 %v1629_v15 }
 0x100   : > { %833 = vmatpush.msra.mxu2 %v610_v6  ;;  %887 = vperm.xlu2 %1422, %v759_v48  }
 0x101   : > { %1423 = vset.pattern.permute.xlu1 %v1629_v15 }
 0x102   : > { %v1355_v22 = vpop.permute.xlu0 %1354  ;;  %v1360_v7 = vpop.permute.xlu1 %1359  ;;  %891 = vperm.xlu1 %1423, %v760_v54  }
 0x103   : > { %v1357_v23 = vunpack.i.h.bf16 %v1355_v22  ;;  %v1356_v24 = vunpack.i.l.bf16 %v1355_v22  ;;  %v1362_v25 = vunpack.i.h.bf16 %v1360_v7  ;;  %v1361_v26 = vunpack.i.l.bf16 %v1360_v7  ;;  %v1410_v10 = vpop.permute.xlu2 %1409  ;;  %v704_v22 = vld [vmem:[#allocation7 + $0x18] sm:$0xff]  ;;  %v706_v7 = vld [vmem:[#allocation7 + $0x28] sm:$0xf] }
 0x104   : > { %v1412_v27 = vunpack.i.h.bf16 %v1410_v10  ;;  %v1411_v28 = vunpack.i.l.bf16 %v1410_v10 }
 0x105   : > { %v490_v29 = vsel %vm489_vm1, %v1356_v24, %v1357_v23  ;;  %v602_v31 = vsel %vm601_vm3, %v1361_v26, %v1362_v25  ;;  %vm771_vm1 = vcmask 130048   ;;  %v707_v24 = vld [vmem:[#allocation7 + $0x30] sm:$0xf]  ;;  %v708_v25 = vld [vmem:[#allocation7 + $0x38] sm:$0xf] }
 0x106   : > { %809 = vmatpush.msra.mxu1 %v490_v29  ;;  %834 = vmatpush.msra.mxu2 %v602_v31  ;;  %v698_v32 = vsel %vm697_vm4, %v1411_v28, %v1412_v27 }
 0x107   : > { %861 = vmatpush.msra.mxu3 %v698_v32 }
 0x108   : > { %810 = vmatpush.msra.mxu1 %v482_v30 }
 0x10a   : > { %v1370_v36 = vpop.permute.xlu0 %1369  ;;  %v1375_v37 = vpop.permute.xlu1 %1374 }
 0x10b   : > { %v1372_v38 = vunpack.i.h.bf16 %v1370_v36  ;;  %v1371_v39 = vunpack.i.l.bf16 %v1370_v36  ;;  %v1377_v42 = vunpack.i.h.bf16 %v1375_v37  ;;  %v1376_v43 = vunpack.i.l.bf16 %v1375_v37 }
 0x10d   : > { %v594_v45 = vsel %vm593_vm5, %v1371_v39, %v1372_v38  ;;  %v474_v46 = vsel %vm473_vm6, %v1376_v43, %v1377_v42 }
 0x10e   : > { %835 = vmatpush.msra.mxu2 %v594_v45  ;;  %811 = vmatpush.msra.mxu1 %v474_v46 }
 0x110   : > { %836 = vmatpush.msra.mxu2 %v586_v47 }
 0x112   : > { %v1385_v52 = vpop.permute.xlu0 %1384  ;;  %v1390_v53 = vpop.permute.xlu1 %1389 }
 0x113   : > { %v1387_v55 = vunpack.i.h.bf16 %v1385_v52  ;;  %v1386_v56 = vunpack.i.l.bf16 %v1385_v52  ;;  %v1392_v57 = vunpack.i.h.bf16 %v1390_v53  ;;  %v1391_v58 = vunpack.i.l.bf16 %v1390_v53 }
 0x115   : > { %v466_v61 = vsel %vm465_vm8, %v1386_v56, %v1387_v55  ;;  %v578_v63 = vsel %vm577_vm10, %v1391_v58, %v1392_v57 }
 0x116   : > { %812 = vmatpush.msra.mxu1 %v466_v61  ;;  %837 = vmatpush.msra.mxu2 %v578_v63 }
 0x118   : > { %813 = vmatpush.msra.mxu1 %v458_v62 }
 0x11a   : > { %v1400_v17 = vpop.permute.xlu0 %1399  ;;  %814 = vmatpush.msra.mxu1 %v450_v3  ;;  %v1405_v11 = vpop.permute.xlu1 %1404 }
 0x11b   : > { %v1402_v41 = vunpack.i.h.bf16 %v1400_v17  ;;  %v1401_v12 = vunpack.i.l.bf16 %v1400_v17  ;;  %v1407_v13 = vunpack.i.h.bf16 %v1405_v11  ;;  %v1406_v14 = vunpack.i.l.bf16 %v1405_v11 }
 0x11c   : > { %815 = vmatpush.msra.mxu1 %v442_v8 }
 0x11d   : > { %v570_v9 = vsel %vm569_vm14, %v1401_v12, %v1402_v41  ;;  %v562_v18 = vsel %vm561_vm15, %v1406_v14, %v1407_v13 }
 0x11e   : > { %816 = vmatpush.msra.mxu1 %v434_v40  ;;  %838 = vmatpush.msra.mxu2 %v570_v9 }
 0x11f   : > { %817 = vmatmul.f32.vlgmr.msra.gmra.mxu1 %v702_v16 }
 0x120   : > { %839 = vmatpush.msra.mxu2 %v562_v18 }
 0x121   : > { %840 = vmatmul.f32.vlgmr.msra.gmra.mxu2 %v703_v19 }
 0x122   : > { %v1415_v6 = vpop.permute.xlu0 %1414 }
 0x123   : > { %v1417_v20 = vunpack.i.h.bf16 %v1415_v6  ;;  %v1416_v21 = vunpack.i.l.bf16 %v1415_v6 }
 0x125   : > { %v690_v23 = vsel %vm689_vm0, %v1416_v21, %v1417_v20 }
 0x126   : > { %862 = vmatpush.msra.mxu3 %v690_v23 }
 0x127   : > { %1041 = vmatmul.msk.f32.vlgmr.msra.gmra.mxu3 %vm771_vm1, %v704_v22  ;;  %820 = vmatmul.f32.gmra.mxu1 %v706_v7 }
 0x129   : > { %843 = vmatmul.f32.gmra.mxu2 %v707_v24 }
 0x12f   : > { %1042 = vmatmul.msk.f32.gmra.mxu3 %vm771_vm1, %v708_v25 }
 0x14c   : > { %v769_v32 = vpop.permute.xlu2 %768 }
 0x15a   : > { %v888_v47 = vpop.permute.xlu2 %887 }
 0x161   : > { %v795_v26 = vpop.f32.mrf.mxu0 }
 0x162   : > { %v764_v10 = vpop.permute.xlu1 %763 }
 0x163   : > { %v796_v28 = vadd.f32 %v795_v26, %v764_v10  ;;  %v878_v43 = vpop.permute.xlu0 %877 }
 0x169   : > { %v798_v31 = vpop.f32.mrf.mxu0 }
 0x16a   : > { %v799_v34 = vadd.f32 %v798_v31, %v769_v32 }
 0x16b   : > { %v882_v44 = vpop.permute.xlu1 %881 }
 0x174   : > { %v892_v52 = vpop.permute.xlu1 %891 }
 0x19c   : > { %v818_v27 = vpop.f32.mrf.mxu1 }
 0x19d   : > { %v819_v29 = vadd.f32 %v818_v27, %v796_v28 }
 0x1a4   : > { %v841_v30 = vpop.f32.mrf.mxu2  ;;  %v821_v35 = vpop.f32.mrf.mxu1 }
 0x1a5   : > { %v842_v33 = vadd.f32 %v841_v30, %v819_v29  ;;  %v822_v38 = vadd.f32 %v821_v35, %v799_v34 }
 0x1aa   : > { %v864_v36 = vpop.f32.mrf.mxu3 }
 0x1ab   : > { %v865_v37 = vadd.f32 %v864_v36, %v842_v33 }
 0x1ac   : > { %v844_v39 = vpop.f32.mrf.mxu2 }
 0x1ad   : > { %v872_v42 = vmul.f32 0.01, %v865_v37  ;;  %vm870_vm2 = vcmp.gt.f32.partialorder %v865_v37, 0.0  ;;  %v845_v46 = vadd.f32 %v844_v39, %v822_v38 }
 0x1af   : > { %v874_v45 = vsel %vm870_vm2, %v865_v37, %v872_v42 }
 0x1b0   : > { %v884_v48 = vmul.f32 %v878_v43, %v874_v45 }
 0x1b2   : > { %v894_v0 = vadd.f32 %v888_v47, %v884_v48  ;;  %v867_v49 = vpop.f32.mrf.mxu3 }
 0x1b3   : > { %v868_v50 = vadd.f32 %v867_v49, %v845_v46 }
 0x1b4   : > { %896 = vst [vmem:[%s303_s24] sm:$0xff] %v894_v0 }
 0x1b5   : > { %vm871_vm3 = vcmp.gt.f32.partialorder %v868_v50, 0.0  ;;  %v873_v51 = vmul.f32 0.01, %v868_v50 }
 0x1b7   : > { %v875_v53 = vsel %vm871_vm3, %v868_v50, %v873_v51 }
 0x1b8   : > { %v885_v54 = vmul.f32 %v882_v44, %v875_v53 }
 0x1ba   : > { %v895_v55 = vadd.f32 %v892_v52, %v885_v54 }
 0x1bc   : > { %897 = vst [vmem:[%s303_s24 + $0x8] sm:$0xf] %v895_v55 }
 0x1bd PF: > { %s20_s20 = sadd.s32 1, %s1573_s20   ;;  %s1925_s11 = sld [smem:[#allocation11_spill]] }
 0x1be   : > { %p17_p2 = scmp.ge.s32.totalorder %s20_s20, 4   ;;  %s1926_s15 = smov %s1557_s16 }
 0x1bf   : > { %s1927_s16 = smov %s1561_s17  ;;  %s1928_s17 = smov %s1730_s12 }
 0x1c0   : > { %s1929_s18 = smov %s1569_s19  ;;  %19 = sbr.rel (!%p17_p2) target bundleno = 8 (0x8), region = 93 }
 0x1c3   : > { %s1930_s19 = smov %s1925_s11 }
 0x1c5   :  { %925 = vsyncpa [#allocation4], 1 }
 0x1c6   :  { %927 = vsyncpa [#allocation4 + $0x1], 1 }
 0x1c7   :  { %928 = vsyncpa [#allocation6], 1 }
 0x1c8   :  { %930 = vsyncpa [#allocation6 + $0x1], 1 }

</bundles_post_ra>
